<compile_context>
chip_gen: v5e
topology: v5e:2x2
jax: 0.10.0
libtpu: 0.0.40
codegen_flags: <defaults>
</compile_context>

<pallas_src>
import jax
import jax.numpy as jnp
from jax.experimental import pallas as pl
from jax.experimental.pallas import tpu as pltpu


def _round_up(n, m):
    return ((n + m - 1) // m) * m


def _cdiv(a, b):
    return -(-a // b)


def _mlp_kernel(x_ref, w1_ref, b1_ref, w2_ref, b2_ref, o_ref):
    # hidden = relu(x @ W1 + b1): bf16 MXU inputs, f32 accumulation.
    x_bf16 = x_ref[...].astype(jnp.bfloat16)            # cast on the VMEM tile
    h = jnp.dot(x_bf16, w1_ref[...], preferred_element_type=jnp.float32)
    h = jnp.maximum(h + b1_ref[...], 0.0)                # bias + ReLU in f32 (VPU)
    # Dropout(0.3): identity in eval mode.
    # logits = h @ W2 + b2 (bf16 MXU inputs, f32 accumulation + f32 bias).
    out = jnp.dot(h.astype(jnp.bfloat16), w2_ref[...],
                  preferred_element_type=jnp.float32)
    o_ref[...] = (out + b2_ref[...]).astype(o_ref.dtype)


def linear_classifier_forward(x, w1, b1, w2, b2, *, block_b=2048,
                              training=False, min_pallas_batch=256):
    """x: (B, input_dim) f32 -> logits (B, num_classes) f32."""
    if training:
        # TODO(synk): implement training-mode dropout with pltpu.prng_random_bits.
        raise NotImplementedError("Dropout is implemented in eval mode only.")

    B, D_in = x.shape
    H = w1.shape[1]
    C = w2.shape[1]
    assert w1.shape == (D_in, H) and b1.shape == (H,)
    assert w2.shape == (H, C) and b2.shape == (C,)

    # Tiny batches: fixed pallas_call/Mosaic launch overhead dominates; let
    # XLA fuse the 3-op MLP instead.
    if B < min_pallas_batch:
        h = jnp.maximum(x.astype(jnp.float32) @ w1 + b1, 0.0)
        return h @ w2 + b2

    # ---- Batch tiling -------------------------------------------------------
    # Cap block_b so the double-buffered f32 x + out tiles stay within ~32 MiB
    # (only relevant for very large D_in; the v5e/v7x limits are handled via
    # vmem_limit_bytes below).
    row_bytes_db = 2 * 4 * (D_in + C)                    # double-buffered bytes/row
    vmem_cap_tb = max(8, ((32 << 20) // row_bytes_db) // 8 * 8)
    block_b = max(8, min(block_b, vmem_cap_tb))

    # >= 2 grid steps so v7x's two TensorCores both get work; TB sized so the
    # last tile is nearly full (minimal batch-padding waste), multiple of 8.
    n_steps = max(2, _cdiv(B, block_b))
    TB = _round_up(_cdiv(B, n_steps), 8)
    grid_b = _cdiv(B, TB)
    B_pad = grid_b * TB

    # ---- HBM-side prep (no lane padding of x; weights cast to bf16 once) ----
    x_in = x if B_pad == B else jnp.pad(x, ((0, B_pad - B), (0, 0)))
    w1_bf = w1.astype(jnp.bfloat16)
    w2_bf = w2.astype(jnp.bfloat16)
    b1_f = b1.astype(jnp.float32).reshape(1, H)
    b2_f = b2.astype(jnp.float32).reshape(1, C)

    grid = (grid_b,)

    # Real (unpadded) FLOPs / bytes for the scheduler.
    cost = pl.CostEstimate(
        flops=2 * B_pad * (D_in * H + H * C),
        transcendentals=0,
        bytes_accessed=(B_pad * D_in * x_in.dtype.itemsize
                        + D_in * H * 2 + H * 4
                        + H * C * 2 + C * 4
                        + B_pad * C * 4),
    )

    # VMEM footprint: double-buffered x / out tiles + resident params
    # (params also get the default 2 buffers).  Only override the scoped-VMEM
    # limit when we would exceed v5e's 16 MiB default; cap well under v7x's
    # 64 MiB physical VMEM.
    vmem_est = (2 * TB * (D_in * 4 + C * 4)
                + 2 * ((D_in * H + H * C) * 2 + (H + C) * 4))
    cp_kwargs = dict(dimension_semantics=("parallel",))
    if vmem_est > (12 << 20):
        cp_kwargs["vmem_limit_bytes"] = min(vmem_est + (4 << 20), 48 << 20)

    out = pl.pallas_call(
        _mlp_kernel,
        out_shape=jax.ShapeDtypeStruct((B_pad, C), jnp.float32),
        grid_spec=pltpu.PrefetchScalarGridSpec(
            num_scalar_prefetch=0,
            grid=grid,
            in_specs=[
                pl.BlockSpec((TB, D_in), lambda i: (i, 0)),   # streamed x tile (f32)
                pl.BlockSpec((D_in, H), lambda i: (0, 0)),    # resident W1 (bf16)
                pl.BlockSpec((1, H), lambda i: (0, 0)),       # resident b1 (f32)
                pl.BlockSpec((H, C), lambda i: (0, 0)),       # resident W2 (bf16)
                pl.BlockSpec((1, C), lambda i: (0, 0)),       # resident b2 (f32)
            ],
            out_specs=pl.BlockSpec((TB, C), lambda i: (i, 0)),  # true-C store
        ),
        compiler_params=pltpu.CompilerParams(**cp_kwargs),
        cost_estimate=cost,
    )(x_in, w1_bf, b1_f, w2_bf, b2_f)

    return out if B_pad == B else out[:B]


if __name__ == "__main__":
    # Small shapes consistent with the module's forward; batch large enough to
    # exercise the Pallas path (>= min_pallas_batch) with a multi-step grid.
    B = 512            # batch
    INPUT_DIM = 32     # input_dim
    HIDDEN = 256       # fixed by the module
    NUM_CLASSES = 10   # num_classes

    key = jax.random.PRNGKey(0)
    kx, kw1, kb1, kw2, kb2 = jax.random.split(key, 5)

    x = jax.random.normal(kx, (B, INPUT_DIM), dtype=jnp.float32)

    # Deterministic parameter init (roughly like torch's default uniform bound).
    bound1 = 1.0 / (INPUT_DIM ** 0.5)
    w1 = jax.random.uniform(kw1, (INPUT_DIM, HIDDEN), jnp.float32, -bound1, bound1)
    b1 = jax.random.uniform(kb1, (HIDDEN,), jnp.float32, -bound1, bound1)
    bound2 = 1.0 / (HIDDEN ** 0.5)
    w2 = jax.random.uniform(kw2, (HIDDEN, NUM_CLASSES), jnp.float32, -bound2, bound2)
    b2 = jax.random.uniform(kb2, (NUM_CLASSES,), jnp.float32, -bound2, bound2)

    out = linear_classifier_forward(x, w1, b1, w2, b2)
    out = jax.block_until_ready(out)
    assert out.shape == (B, NUM_CLASSES)

    # Reference matching the kernel's precision policy (bf16 matmuls, f32 acc).
    h_ref = jnp.maximum(
        jnp.dot(x.astype(jnp.bfloat16), w1.astype(jnp.bfloat16),
                preferred_element_type=jnp.float32) + b1, 0.0)
    ref_bf16 = jnp.dot(h_ref.astype(jnp.bfloat16), w2.astype(jnp.bfloat16),
                       preferred_element_type=jnp.float32) + b2
    assert jnp.allclose(out, ref_bf16, atol=1e-2, rtol=1e-2)

    # Loose sanity check vs. full-f32 math (bf16 rounding tolerance).
    ref_f32 = jnp.maximum(x @ w1 + b1, 0.0) @ w2 + b2
    assert jnp.allclose(out, ref_f32, atol=5e-2, rtol=5e-2)

    print("KERNEL_OK")
</pallas_src>

<mosaic_0001>
module attributes {stable_mosaic.version = 11 : i64} {
  func.func @_mlp_kernel(%arg0: i32, %arg1: memref<256x32xf32, #tpu.memory_space<vmem>>, %arg2: memref<32x256xbf16, #tpu.memory_space<vmem>>, %arg3: memref<1x256xf32, #tpu.memory_space<vmem>>, %arg4: memref<256x10xbf16, #tpu.memory_space<vmem>>, %arg5: memref<1x10xf32, #tpu.memory_space<vmem>>, %arg6: memref<256x10xf32, #tpu.memory_space<vmem>>) attributes {dimension_semantics = [#tpu.dimension_semantics<parallel>], iteration_bounds = array<i64: 2>, scalar_prefetch = 0 : i64, scratch_operands = 0 : i64, tpu.core_type = #tpu.core_type<tc>, window_params = [{transform_indices = @transform_0, window_bounds = array<i64: 256, 32>}, {pipeline_mode = #tpu.pipeline_mode<synchronous>, transform_indices = @transform_1, window_bounds = array<i64: 32, 256>}, {pipeline_mode = #tpu.pipeline_mode<synchronous>, transform_indices = @transform_2, window_bounds = array<i64: 1, 256>}, {pipeline_mode = #tpu.pipeline_mode<synchronous>, transform_indices = @transform_3, window_bounds = array<i64: 256, 10>}, {pipeline_mode = #tpu.pipeline_mode<synchronous>, transform_indices = @transform_4, window_bounds = array<i64: 1, 10>}, {transform_indices = @transform_5, window_bounds = array<i64: 256, 10>}]} {
    %c0 = arith.constant 0 : index
    %c0_0 = arith.constant 0 : index
    %0 = vector.load %arg1[%c0, %c0_0] : memref<256x32xf32, #tpu.memory_space<vmem>>, vector<256x32xf32>
    %1 = arith.truncf %0 : vector<256x32xf32> to vector<256x32xbf16>
    %c0_1 = arith.constant 0 : index
    %c0_2 = arith.constant 0 : index
    %2 = vector.load %arg2[%c0_1, %c0_2] : memref<32x256xbf16, #tpu.memory_space<vmem>>, vector<32x256xbf16>
    %cst = arith.constant dense<0.000000e+00> : vector<256x256xf32>
    %3 = tpu.matmul %1, %2, %cst {dimension_numbers = #tpu.dot_dimension_numbers<[1], [0], [0], [1], [0, 0, 1, 1], [], []>} : vector<256x32xbf16>, vector<32x256xbf16>, vector<256x256xf32> -> vector<256x256xf32>
    %c0_3 = arith.constant 0 : index
    %c0_4 = arith.constant 0 : index
    %4 = vector.load %arg3[%c0_3, %c0_4] : memref<1x256xf32, #tpu.memory_space<vmem>>, vector<1x256xf32>
    %5 = vector.broadcast %4 : vector<1x256xf32> to vector<256x256xf32>
    %6 = arith.addf %3, %5 : vector<256x256xf32>
    %cst_5 = arith.constant 0.000000e+00 : f32
    %7 = vector.broadcast %cst_5 : f32 to vector<256x256xf32>
    %8 = arith.maximumf %6, %7 : vector<256x256xf32>
    %9 = arith.truncf %8 : vector<256x256xf32> to vector<256x256xbf16>
    %c0_6 = arith.constant 0 : index
    %c0_7 = arith.constant 0 : index
    %10 = vector.load %arg4[%c0_6, %c0_7] : memref<256x10xbf16, #tpu.memory_space<vmem>>, vector<256x10xbf16>
    %cst_8 = arith.constant dense<0.000000e+00> : vector<256x10xf32>
    %11 = tpu.matmul %9, %10, %cst_8 {dimension_numbers = #tpu.dot_dimension_numbers<[1], [0], [0], [1], [0, 0, 1, 1], [], []>} : vector<256x256xbf16>, vector<256x10xbf16>, vector<256x10xf32> -> vector<256x10xf32>
    %c0_9 = arith.constant 0 : index
    %c0_10 = arith.constant 0 : index
    %12 = vector.load %arg5[%c0_9, %c0_10] : memref<1x10xf32, #tpu.memory_space<vmem>>, vector<1x10xf32>
    %13 = vector.broadcast %12 : vector<1x10xf32> to vector<256x10xf32>
    %14 = arith.addf %11, %13 : vector<256x10xf32>
    %c0_11 = arith.constant 0 : index
    %c0_12 = arith.constant 0 : index
    %15 = vector.load %arg6[%c0_11, %c0_12] : memref<256x10xf32, #tpu.memory_space<vmem>>, vector<256x10xf32>
    tpu.vector_store %arg6[%c0_11, %c0_12], %14 {strides = array<i32>} : memref<256x10xf32, #tpu.memory_space<vmem>>, vector<256x10xf32>,
    return
  }
  func.func @transform_0(%arg0: i32) -> (i32, i32) {
    %c0_i32 = arith.constant 0 : i32
    %c0_i32_0 = arith.constant 0 : i32
    return %arg0, %c0_i32 : i32, i32
  }
  func.func @transform_1(%arg0: i32) -> (i32, i32) {
    %c0_i32 = arith.constant 0 : i32
    %c0_i32_0 = arith.constant 0 : i32
    %c0_i32_1 = arith.constant 0 : i32
    return %c0_i32, %c0_i32_0 : i32, i32
  }
  func.func @transform_2(%arg0: i32) -> (i32, i32) {
    %c0_i32 = arith.constant 0 : i32
    %c0_i32_0 = arith.constant 0 : i32
    %c0_i32_1 = arith.constant 0 : i32
    return %c0_i32, %c0_i32_0 : i32, i32
  }
  func.func @transform_3(%arg0: i32) -> (i32, i32) {
    %c0_i32 = arith.constant 0 : i32
    %c0_i32_0 = arith.constant 0 : i32
    %c0_i32_1 = arith.constant 0 : i32
    return %c0_i32, %c0_i32_0 : i32, i32
  }
  func.func @transform_4(%arg0: i32) -> (i32, i32) {
    %c0_i32 = arith.constant 0 : i32
    %c0_i32_0 = arith.constant 0 : i32
    %c0_i32_1 = arith.constant 0 : i32
    return %c0_i32, %c0_i32_0 : i32, i32
  }
  func.func @transform_5(%arg0: i32) -> (i32, i32) {
    %c0_i32 = arith.constant 0 : i32
    %c0_i32_0 = arith.constant 0 : i32
    return %arg0, %c0_i32 : i32, i32
  }
}

</mosaic_0001>

<bundles_post_ra>
// kernel: tpu_custom_call.1
= control target key start
LH: loop header
LB: loop body
LE: loop exit
PB: predicated region body
PF: predicated region fallthrough
CT: control target
= control target key end

     0   :  { %s1219_s18 = smov 0   ;;  %s1555_s0 = inlined_call_operand.vmem [shape: f32[512,32], index: 0, kind: input, shape index: {}]   ;;  %s1556_s1 = inlined_call_operand.vmem [shape: bf16[32,256], index: 1, kind: input, shape index: {}]   ;;  %s1557_s2 = inlined_call_operand.vmem [shape: f32[1,256], index: 2, kind: input, shape index: {}]   ;;  %s1558_s3 = inlined_call_operand.vmem [shape: bf16[256,10], index: 3, kind: input, shape index: {}]   ;;  %s1559_s4 = inlined_call_operand.vmem [shape: f32[1,10], index: 4, kind: input, shape index: {}]   ;;  %s1560_s5 = inlined_call_operand.vmem [shape: f32[512,10], index: 5, kind: output, shape index: {}]  }
   0x1 LB: > { %s1029_s19 = sadd.s32 4294967295, %s1187_s18   ;;  %p1033_p0 = scmp.ge.s32.totalorder %s1187_s18, 1  ;;  %s1187_s18 = sphi %s1219_s18, %s15_s18  }
   0x2   : > { %p188_p1 = scmp.lt.s32.totalorder %s1187_s18, 3 }
   0x4   : > { %p189_p2 = pnand %p1033_p0, %p188_p1 }
   0x5   : > { %s1034_s11 = sshll.u32 (!%p189_p2), %s1029_s19, 5 }
   0x6   : > { %192 = sbr.rel (%p189_p2) target bundleno = 546 (0x222), region = 40  ;;  %p217_p3 = scmp.lt.s32.totalorder (!%p189_p2), %s1034_s11, 63 }
   0xb   : > { %v1048_v0 = vld [vmem:[%s1556_s1 + $0x10] sm:$0xf]  ;;  %v1155_v1 = vld [vmem:[%s1556_s1 + $0x14] sm:$0xf0]  ;;  %v1154_v2 = vld [vmem:[%s1556_s1 + $0x14] sm:$0xf] }
   0xc   : > { %v1049_v3 = vor.u32 %v1155_v1, %v1048_v0  ;;  %v1050_v4 = vld [vmem:[%s1556_s1 + $0x18] sm:$0xf0]  ;;  %v1040_v5 = vld [vmem:[%s1556_s1] sm:$0xf]  ;;  %v1153_v6 = vld [vmem:[%s1556_s1 + $0x4] sm:$0xf0] }
   0xd   : > { %v1053_v7 = vor.u32 %v1154_v2, %v1050_v4  ;;  %v1152_v8 = vld [vmem:[%s1556_s1 + $0x4] sm:$0xf]  ;;  %v1042_v9 = vld [vmem:[%s1556_s1 + $0x8] sm:$0xf0]  ;;  %v1041_v10 = vor.u32 %v1153_v6, %v1040_v5  ;;  %s1562_s11 = smov (!%p217_p3, %s1034_s11), 63  ;;  %vm307_vm0 = vcmask 261120  }
   0xe   : > { %362 = vmatpush.bf16.msra.mxu0 %v1049_v3  ;;  %v1045_v11 = vor.u32 %v1152_v8, %v1042_v9  ;;  %s1035_s12 = sshll.u32 %s1562_s11, 3  ;;  %v1163_v27 = vld [vmem:[%s1558_s3 + $0x38] sm:$0xff]  ;;  %v1162_v32 = vld [vmem:[%s1558_s3 + $0x30] sm:$0xff]  ;;  %v1161_v34 = vld [vmem:[%s1558_s3 + $0x28] sm:$0xff]  ;;  %vm940_vm1 = vcmask 80896  }
   0xf   : > { %451 = vmatpush.bf16.msra.mxu1 %v1053_v7  ;;  %s1259_s15 = scalar_lea.vmem %s1555_s0, %s1035_s12  ;;  %v1171_v28 = vld [vmem:[%s1558_s3 + $0x78] sm:$0xff]  ;;  %762 = vmatpush.bf16.msra.mxu2 %v1163_v27  ;;  %v1170_v33 = vld [vmem:[%s1558_s3 + $0x70] sm:$0xff]  ;;  %v1169_v35 = vld [vmem:[%s1558_s3 + $0x68] sm:$0xff]  ;;  %s1427_s8 = scalar_lea.vmem %s1560_s5, %s1035_s12 }
  0x10   : > { %v229_v12 = vld [vmem:[%s1259_s15] sm:$0xff]  ;;  %v230_v13 = vld [vmem:[%s1259_s15 + $0x8] sm:$0xff]  ;;  %v231_v15 = vld [vmem:[%s1259_s15 + $0x10] sm:$0xff]  ;;  %851 = vmatpush.bf16.msra.mxu3 %v1171_v28 }
  0x11   : > { %v261_v14 = vpack.c.bf16 %v230_v13, %v229_v12  ;;  %v232_v16 = vld [vmem:[%s1259_s15 + $0x18] sm:$0xff]  ;;  %v233_v18 = vld [vmem:[%s1259_s15 + $0x20] sm:$0xff]  ;;  %v234_v19 = vld [vmem:[%s1259_s15 + $0x28] sm:$0xff] }
  0x12   : > { %363 = vmatpush.bf16.msra.mxu0 %v1041_v10  ;;  %v262_v17 = vpack.c.bf16 %v232_v16, %v231_v15  ;;  %v263_v20 = vpack.c.bf16 %v234_v19, %v233_v18  ;;  %v235_v21 = vld [vmem:[%s1259_s15 + $0x30] sm:$0xff]  ;;  %v236_v22 = vld [vmem:[%s1259_s15 + $0x38] sm:$0xff]  ;;  %v237_v24 = vld [vmem:[%s1259_s15 + $0x40] sm:$0xff] }
  0x13   : > { %452 = vmatpush.bf16.msra.mxu1 %v1045_v11  ;;  %v264_v23 = vpack.c.bf16 %v236_v22, %v235_v21  ;;  %v238_v25 = vld [vmem:[%s1259_s15 + $0x48] sm:$0xff]  ;;  %v239_v29 = vld [vmem:[%s1259_s15 + $0x50] sm:$0xff]  ;;  %v240_v30 = vld [vmem:[%s1259_s15 + $0x58] sm:$0xff]  ;;  %763 = vmatpush.bf16.msra.mxu2 %v1162_v32 }
  0x14   : > { %v265_v26 = vpack.c.bf16 %v238_v25, %v237_v24  ;;  %v266_v31 = vpack.c.bf16 %v240_v30, %v239_v29  ;;  %852 = vmatpush.bf16.msra.mxu3 %v1170_v33  ;;  %v1160_v36 = vld [vmem:[%s1558_s3 + $0x20] sm:$0xff]  ;;  %v242_v39 = vld [vmem:[%s1259_s15 + $0x68] sm:$0xff]  ;;  %v1159_v40 = vld [vmem:[%s1558_s3 + $0x18] sm:$0xff] }
  0x15   : > { %1054 = vmatmul.msk.bf16.vlgmr.msra.gmra.mxu0 %vm307_vm0, %v261_v14  ;;  %v1168_v37 = vld [vmem:[%s1558_s3 + $0x60] sm:$0xff]  ;;  %v1167_v41 = vld [vmem:[%s1558_s3 + $0x58] sm:$0xff]  ;;  %v1158_v43 = vld [vmem:[%s1558_s3 + $0x10] sm:$0xff] }
  0x16   : > { %1070 = vmatmul.msk.bf16.vlgmr.msra.gmra.mxu1 %vm307_vm0, %v261_v14  ;;  %v241_v38 = vld [vmem:[%s1259_s15 + $0x60] sm:$0xff]  ;;  %v1166_v44 = vld [vmem:[%s1558_s3 + $0x50] sm:$0xff]  ;;  %v1157_v45 = vld [vmem:[%s1558_s3 + $0x8] sm:$0xff] }
  0x17   : > { %764 = vmatpush.bf16.msra.mxu2 %v1161_v34  ;;  %v267_v42 = vpack.c.bf16 %v242_v39, %v241_v38  ;;  %v1165_v46 = vld [vmem:[%s1558_s3 + $0x48] sm:$0xff]  ;;  %v1156_v47 = vld [vmem:[%s1558_s3] sm:$0xff]  ;;  %v243_v49 = vld [vmem:[%s1259_s15 + $0x70] sm:$0xff] }
  0x18   : > { %853 = vmatpush.bf16.msra.mxu3 %v1169_v35  ;;  %v1164_v48 = vld [vmem:[%s1558_s3 + $0x40] sm:$0xff]  ;;  %v244_v50 = vld [vmem:[%s1259_s15 + $0x78] sm:$0xff]  ;;  %v246_v53 = vld [vmem:[%s1259_s15 + $0x88] sm:$0xff] }
  0x19   : > { %v268_v51 = vpack.c.bf16 %v244_v50, %v243_v49  ;;  %v245_v52 = vld [vmem:[%s1259_s15 + $0x80] sm:$0xff]  ;;  %v247_v6 = vld [vmem:[%s1259_s15 + $0x90] sm:$0xff]  ;;  %v248_v7 = vld [vmem:[%s1259_s15 + $0x98] sm:$0xff] }
  0x1a   : > { %v269_v54 = vpack.c.bf16 %v246_v53, %v245_v52  ;;  %v281_v55 = vld [vmem:[%s1557_s2] sm:$0x3]  ;;  %v270_v10 = vpack.c.bf16 %v248_v7, %v247_v6  ;;  %v250_v24 = vld [vmem:[%s1259_s15 + $0xa8] sm:$0xff] }
  0x1b   : > { %765 = vmatpush.bf16.msra.mxu2 %v1160_v36  ;;  %v1346_v58 = vperm.slane %v281_v55, 0  ;;  %v1348_v59 = vperm.slane %v281_v55, 1 }
  0x1c   : > { %854 = vmatpush.bf16.msra.mxu3 %v1168_v37 }
  0x1f   : > { %766 = vmatpush.bf16.msra.mxu2 %v1159_v40  ;;  %v251_v40 = vld [vmem:[%s1259_s15 + $0xb0] sm:$0xff] }
  0x20   : > { %855 = vmatpush.bf16.msra.mxu3 %v1167_v41  ;;  %v252_v41 = vld [vmem:[%s1259_s15 + $0xb8] sm:$0xff] }
  0x23   : > { %767 = vmatpush.bf16.msra.mxu2 %v1158_v43 }
  0x24   : > { %856 = vmatpush.bf16.msra.mxu3 %v1166_v44  ;;  %v272_v44 = vpack.c.bf16 %v252_v41, %v251_v40 }
  0x25   : > { %1055 = vmatmul.msk.bf16.gmra.mxu0 %vm307_vm0, %v262_v17 }
  0x26   : > { %1071 = vmatmul.msk.bf16.gmra.mxu1 %vm307_vm0, %v262_v17 }
  0x27   : > { %768 = vmatpush.bf16.msra.mxu2 %v1157_v45 }
  0x28   : > { %857 = vmatpush.bf16.msra.mxu3 %v1165_v46 }
  0x2b   : > { %769 = vmatpush.bf16.msra.mxu2 %v1156_v47 }
  0x2c   : > { %858 = vmatpush.bf16.msra.mxu3 %v1164_v48 }
  0x35   : > { %1056 = vmatmul.msk.bf16.gmra.mxu0 %vm307_vm0, %v263_v20 }
  0x36   : > { %1072 = vmatmul.msk.bf16.gmra.mxu1 %vm307_vm0, %v263_v20 }
  0x45   : > { %1057 = vmatmul.msk.bf16.gmra.mxu0 %vm307_vm0, %v264_v23 }
  0x46   : > { %1073 = vmatmul.msk.bf16.gmra.mxu1 %vm307_vm0, %v264_v23  ;;  %v249_v23 = vld [vmem:[%s1259_s15 + $0xa0] sm:$0xff] }
  0x47   : > { %v271_v27 = vpack.c.bf16 %v250_v24, %v249_v23 }
  0x55   : > { %1058 = vmatmul.msk.bf16.gmra.mxu0 %vm307_vm0, %v265_v26 }
  0x56   : > { %1074 = vmatmul.msk.bf16.gmra.mxu1 %vm307_vm0, %v265_v26 }
  0x65   : > { %1059 = vmatmul.msk.bf16.gmra.mxu0 %vm307_vm0, %v266_v31 }
  0x66   : > { %1075 = vmatmul.msk.bf16.gmra.mxu1 %vm307_vm0, %v266_v31 }
  0x75   : > { %1060 = vmatmul.msk.bf16.gmra.mxu0 %vm307_vm0, %v267_v42 }
  0x76   : > { %1076 = vmatmul.msk.bf16.gmra.mxu1 %vm307_vm0, %v267_v42 }
  0x85   : > { %1061 = vmatmul.msk.bf16.gmra.mxu0 %vm307_vm0, %v268_v51 }
  0x86   : > { %1077 = vmatmul.msk.bf16.gmra.mxu1 %vm307_vm0, %v268_v51 }
  0x92   : > { %v365_v56 = vpop.f32.mrf.mxu0 }
  0x93   : > { %v454_v57 = vpop.f32.mrf.mxu1  ;;  %v366_v60 = vadd.f32 %v365_v56, %v1346_v58 }
  0x94   : > { %v455_v61 = vadd.f32 %v454_v57, %v1348_v59  ;;  %v253_v57 = vld [vmem:[%s1259_s15 + $0xc0] sm:$0xff] }
  0x95   : > { %1062 = vmatmul.msk.bf16.gmra.mxu0 %vm307_vm0, %v269_v54  ;;  %v534_v2 = vmax.f32 %v366_v60, 0.0  ;;  %v254_v60 = vld [vmem:[%s1259_s15 + $0xc8] sm:$0xff] }
  0x96   : > { %1078 = vmatmul.msk.bf16.gmra.mxu1 %vm307_vm0, %v269_v54  ;;  %v535_v3 = vmax.f32 %v455_v61, 0.0 }
  0x9a   : > { %v367_v62 = vpop.f32.mrf.mxu0 }
  0x9b   : > { %v456_v63 = vpop.f32.mrf.mxu1  ;;  %v368_v0 = vadd.f32 %v367_v62, %v1346_v58 }
  0x9c   : > { %v457_v1 = vadd.f32 %v456_v63, %v1348_v59  ;;  %v273_v63 = vpack.c.bf16 %v254_v60, %v253_v57 }
  0x9d   : > { %v536_v4 = vmax.f32 %v368_v0, 0.0 }
  0x9e   : > { %v537_v5 = vmax.f32 %v457_v1, 0.0 }
  0x9f   : > { %v598_v8 = vpack.c.bf16 %v536_v4, %v534_v2 }
  0xa0   : > { %v599_v9 = vpack.c.bf16 %v537_v5, %v535_v3 }
  0xa1   : > { %770 = vmatmul.bf16.vlgmr.msra.gmra.mxu2 %v598_v8 }
  0xa2   : > { %859 = vmatmul.bf16.vlgmr.msra.gmra.mxu3 %v599_v9  ;;  %v370_v11 = vpop.f32.mrf.mxu0 }
  0xa3   : > { %v459_v12 = vpop.f32.mrf.mxu1  ;;  %v371_v13 = vadd.f32 %v370_v11, %v1346_v58 }
  0xa4   : > { %v460_v14 = vadd.f32 %v459_v12, %v1348_v59  ;;  %v255_v12 = vld [vmem:[%s1259_s15 + $0xd0] sm:$0xff] }
  0xa5   : > { %1063 = vmatmul.msk.bf16.gmra.mxu0 %vm307_vm0, %v270_v10  ;;  %v538_v19 = vmax.f32 %v371_v13, 0.0  ;;  %v256_v13 = vld [vmem:[%s1259_s15 + $0xd8] sm:$0xff] }
  0xa6   : > { %1079 = vmatmul.msk.bf16.gmra.mxu1 %vm307_vm0, %v270_v10  ;;  %v539_v20 = vmax.f32 %v460_v14, 0.0 }
  0xaa   : > { %v372_v15 = vpop.f32.mrf.mxu0 }
  0xab   : > { %v461_v16 = vpop.f32.mrf.mxu1  ;;  %v373_v17 = vadd.f32 %v372_v15, %v1346_v58 }
  0xac   : > { %v462_v18 = vadd.f32 %v461_v16, %v1348_v59  ;;  %v274_v16 = vpack.c.bf16 %v256_v13, %v255_v12 }
  0xad   : > { %v540_v21 = vmax.f32 %v373_v17, 0.0 }
  0xae   : > { %v541_v22 = vmax.f32 %v462_v18, 0.0 }
  0xaf   : > { %v600_v25 = vpack.c.bf16 %v540_v21, %v538_v19 }
  0xb0   : > { %v601_v26 = vpack.c.bf16 %v541_v22, %v539_v20 }
  0xb1   : > { %775 = vmatmul.bf16.gmra.mxu2 %v600_v25 }
  0xb2   : > { %864 = vmatmul.bf16.gmra.mxu3 %v601_v26  ;;  %v375_v28 = vpop.f32.mrf.mxu0 }
  0xb3   : > { %v464_v29 = vpop.f32.mrf.mxu1  ;;  %v376_v30 = vadd.f32 %v375_v28, %v1346_v58 }
  0xb4   : > { %v465_v31 = vadd.f32 %v464_v29, %v1348_v59  ;;  %v257_v29 = vld [vmem:[%s1259_s15 + $0xe0] sm:$0xff] }
  0xb5   : > { %1064 = vmatmul.msk.bf16.gmra.mxu0 %vm307_vm0, %v271_v27  ;;  %v542_v36 = vmax.f32 %v376_v30, 0.0  ;;  %v258_v30 = vld [vmem:[%s1259_s15 + $0xe8] sm:$0xff] }
  0xb6   : > { %1080 = vmatmul.msk.bf16.gmra.mxu1 %vm307_vm0, %v271_v27  ;;  %v543_v37 = vmax.f32 %v465_v31, 0.0 }
  0xba   : > { %v377_v32 = vpop.f32.mrf.mxu0 }
  0xbb   : > { %v466_v33 = vpop.f32.mrf.mxu1  ;;  %v378_v34 = vadd.f32 %v377_v32, %v1346_v58 }
  0xbc   : > { %v467_v35 = vadd.f32 %v466_v33, %v1348_v59  ;;  %v275_v33 = vpack.c.bf16 %v258_v30, %v257_v29 }
  0xbd   : > { %v544_v38 = vmax.f32 %v378_v34, 0.0 }
  0xbe   : > { %v545_v39 = vmax.f32 %v467_v35, 0.0 }
  0xbf   : > { %v602_v42 = vpack.c.bf16 %v544_v38, %v542_v36 }
  0xc0   : > { %v603_v43 = vpack.c.bf16 %v545_v39, %v543_v37 }
  0xc1   : > { %780 = vmatmul.bf16.gmra.mxu2 %v602_v42 }
  0xc2   : > { %869 = vmatmul.bf16.gmra.mxu3 %v603_v43  ;;  %v380_v45 = vpop.f32.mrf.mxu0 }
  0xc3   : > { %v469_v46 = vpop.f32.mrf.mxu1  ;;  %v381_v47 = vadd.f32 %v380_v45, %v1346_v58 }
  0xc4   : > { %v470_v48 = vadd.f32 %v469_v46, %v1348_v59  ;;  %v259_v46 = vld [vmem:[%s1259_s15 + $0xf0] sm:$0xff] }
  0xc5   : > { %1065 = vmatmul.msk.bf16.gmra.mxu0 %vm307_vm0, %v272_v44  ;;  %v546_v53 = vmax.f32 %v381_v47, 0.0  ;;  %v260_v47 = vld [vmem:[%s1259_s15 + $0xf8] sm:$0xff] }
  0xc6   : > { %1081 = vmatmul.msk.bf16.gmra.mxu1 %vm307_vm0, %v272_v44  ;;  %v547_v54 = vmax.f32 %v470_v48, 0.0 }
  0xca   : > { %v382_v49 = vpop.f32.mrf.mxu0 }
  0xcb   : > { %v471_v50 = vpop.f32.mrf.mxu1  ;;  %v383_v51 = vadd.f32 %v382_v49, %v1346_v58 }
  0xcc   : > { %v472_v52 = vadd.f32 %v471_v50, %v1348_v59  ;;  %v276_v50 = vpack.c.bf16 %v260_v47, %v259_v46 }
  0xcd   : > { %v548_v55 = vmax.f32 %v383_v51, 0.0 }
  0xce   : > { %v549_v56 = vmax.f32 %v472_v52, 0.0 }
  0xcf   : > { %v604_v61 = vpack.c.bf16 %v548_v55, %v546_v53 }
  0xd0   : > { %v605_v62 = vpack.c.bf16 %v549_v56, %v547_v54 }
  0xd1   : > { %785 = vmatmul.bf16.gmra.mxu2 %v604_v61 }
  0xd2   : > { %874 = vmatmul.bf16.gmra.mxu3 %v605_v62  ;;  %v385_v0 = vpop.f32.mrf.mxu0 }
  0xd3   : > { %v474_v1 = vpop.f32.mrf.mxu1  ;;  %v386_v2 = vadd.f32 %v385_v0, %v1346_v58 }
  0xd4   : > { %v475_v3 = vadd.f32 %v474_v1, %v1348_v59 }
  0xd5   : > { %1066 = vmatmul.msk.bf16.gmra.mxu0 %vm307_vm0, %v273_v63  ;;  %v550_v8 = vmax.f32 %v386_v2, 0.0 }
  0xd6   : > { %1082 = vmatmul.msk.bf16.gmra.mxu1 %vm307_vm0, %v273_v63  ;;  %v551_v9 = vmax.f32 %v475_v3, 0.0 }
  0xda   : > { %v387_v4 = vpop.f32.mrf.mxu0 }
  0xdb   : > { %v476_v5 = vpop.f32.mrf.mxu1  ;;  %v388_v6 = vadd.f32 %v387_v4, %v1346_v58 }
  0xdc   : > { %v477_v7 = vadd.f32 %v476_v5, %v1348_v59 }
  0xdd   : > { %v552_v10 = vmax.f32 %v388_v6, 0.0 }
  0xde   : > { %v553_v11 = vmax.f32 %v477_v7, 0.0 }
  0xdf   : > { %v606_v14 = vpack.c.bf16 %v552_v10, %v550_v8 }
  0xe0   : > { %v607_v15 = vpack.c.bf16 %v553_v11, %v551_v9 }
  0xe1   : > { %790 = vmatmul.bf16.gmra.mxu2 %v606_v14 }
  0xe2   : > { %879 = vmatmul.bf16.gmra.mxu3 %v607_v15  ;;  %v390_v17 = vpop.f32.mrf.mxu0 }
  0xe3   : > { %v479_v18 = vpop.f32.mrf.mxu1  ;;  %v391_v19 = vadd.f32 %v390_v17, %v1346_v58  ;;  %v1419_v17 = vld [vmem:[%s1559_s4] ss:$0 sm:$0xff] }
  0xe4   : > { %v480_v20 = vadd.f32 %v479_v18, %v1348_v59 }
  0xe5   : > { %1067 = vmatmul.msk.bf16.gmra.mxu0 %vm307_vm0, %v274_v16  ;;  %v554_v25 = vmax.f32 %v391_v19, 0.0 }
  0xe6   : > { %1083 = vmatmul.msk.bf16.gmra.mxu1 %vm307_vm0, %v274_v16  ;;  %v555_v26 = vmax.f32 %v480_v20, 0.0 }
  0xea   : > { %v392_v21 = vpop.f32.mrf.mxu0 }
  0xeb   : > { %v481_v22 = vpop.f32.mrf.mxu1  ;;  %v393_v23 = vadd.f32 %v392_v21, %v1346_v58 }
  0xec   : > { %v482_v24 = vadd.f32 %v481_v22, %v1348_v59 }
  0xed   : > { %v556_v27 = vmax.f32 %v393_v23, 0.0 }
  0xee   : > { %v557_v28 = vmax.f32 %v482_v24, 0.0 }
  0xef   : > { %v608_v31 = vpack.c.bf16 %v556_v27, %v554_v25 }
  0xf0   : > { %v609_v32 = vpack.c.bf16 %v557_v28, %v555_v26 }
  0xf1   : > { %795 = vmatmul.bf16.gmra.mxu2 %v608_v31 }
  0xf2   : > { %884 = vmatmul.bf16.gmra.mxu3 %v609_v32  ;;  %v395_v34 = vpop.f32.mrf.mxu0 }
  0xf3   : > { %v484_v35 = vpop.f32.mrf.mxu1  ;;  %v396_v36 = vadd.f32 %v395_v34, %v1346_v58 }
  0xf4   : > { %v485_v37 = vadd.f32 %v484_v35, %v1348_v59 }
  0xf5   : > { %1068 = vmatmul.msk.bf16.gmra.mxu0 %vm307_vm0, %v275_v33  ;;  %v558_v42 = vmax.f32 %v396_v36, 0.0 }
  0xf6   : > { %1084 = vmatmul.msk.bf16.gmra.mxu1 %vm307_vm0, %v275_v33  ;;  %v559_v43 = vmax.f32 %v485_v37, 0.0 }
  0xfa   : > { %v397_v38 = vpop.f32.mrf.mxu0 }
  0xfb   : > { %v486_v39 = vpop.f32.mrf.mxu1  ;;  %v398_v40 = vadd.f32 %v397_v38, %v1346_v58 }
  0xfc   : > { %v487_v41 = vadd.f32 %v486_v39, %v1348_v59 }
  0xfd   : > { %v560_v44 = vmax.f32 %v398_v40, 0.0 }
  0xfe   : > { %v561_v45 = vmax.f32 %v487_v41, 0.0 }
  0xff   : > { %v610_v48 = vpack.c.bf16 %v560_v44, %v558_v42 }
 0x100   : > { %v611_v49 = vpack.c.bf16 %v561_v45, %v559_v43 }
 0x101   : > { %800 = vmatmul.bf16.gmra.mxu2 %v610_v48 }
 0x102   : > { %889 = vmatmul.bf16.gmra.mxu3 %v611_v49  ;;  %v400_v51 = vpop.f32.mrf.mxu0 }
 0x103   : > { %v489_v52 = vpop.f32.mrf.mxu1  ;;  %v401_v53 = vadd.f32 %v400_v51, %v1346_v58 }
 0x104   : > { %v490_v54 = vadd.f32 %v489_v52, %v1348_v59 }
 0x105   : > { %1069 = vmatmul.msk.bf16.gmra.mxu0 %vm307_vm0, %v276_v50  ;;  %v562_v61 = vmax.f32 %v401_v53, 0.0 }
 0x106   : > { %1085 = vmatmul.msk.bf16.gmra.mxu1 %vm307_vm0, %v276_v50  ;;  %v563_v62 = vmax.f32 %v490_v54, 0.0 }
 0x10a   : > { %v402_v55 = vpop.f32.mrf.mxu0 }
 0x10b   : > { %v491_v56 = vpop.f32.mrf.mxu1  ;;  %v403_v57 = vadd.f32 %v402_v55, %v1346_v58 }
 0x10c   : > { %v492_v60 = vadd.f32 %v491_v56, %v1348_v59 }
 0x10d   : > { %v564_v63 = vmax.f32 %v403_v57, 0.0 }
 0x10e   : > { %v565_v0 = vmax.f32 %v492_v60, 0.0 }
 0x10f   : > { %v612_v1 = vpack.c.bf16 %v564_v63, %v562_v61 }
 0x110   : > { %v613_v2 = vpack.c.bf16 %v565_v0, %v563_v62 }
 0x111   : > { %805 = vmatmul.bf16.gmra.mxu2 %v612_v1 }
 0x112   : > { %894 = vmatmul.bf16.gmra.mxu3 %v613_v2  ;;  %v405_v3 = vpop.f32.mrf.mxu0 }
 0x113   : > { %v494_v4 = vpop.f32.mrf.mxu1  ;;  %v406_v5 = vadd.f32 %v405_v3, %v1346_v58 }
 0x114   : > { %v495_v6 = vadd.f32 %v494_v4, %v1348_v59 }
 0x115   : > { %v566_v11 = vmax.f32 %v406_v5, 0.0 }
 0x116   : > { %v567_v12 = vmax.f32 %v495_v6, 0.0 }
 0x11a   : > { %v407_v7 = vpop.f32.mrf.mxu0 }
 0x11b   : > { %v496_v8 = vpop.f32.mrf.mxu1  ;;  %v408_v9 = vadd.f32 %v407_v7, %v1346_v58 }
 0x11c   : > { %v497_v10 = vadd.f32 %v496_v8, %v1348_v59 }
 0x11d   : > { %v568_v13 = vmax.f32 %v408_v9, 0.0 }
 0x11e   : > { %v569_v14 = vmax.f32 %v497_v10, 0.0 }
 0x11f   : > { %v614_v15 = vpack.c.bf16 %v568_v13, %v566_v11 }
 0x120   : > { %v615_v16 = vpack.c.bf16 %v569_v14, %v567_v12 }
 0x121   : > { %810 = vmatmul.bf16.gmra.mxu2 %v614_v15 }
 0x122   : > { %899 = vmatmul.bf16.gmra.mxu3 %v615_v16  ;;  %v410_v18 = vpop.f32.mrf.mxu0 }
 0x123   : > { %v499_v19 = vpop.f32.mrf.mxu1  ;;  %v411_v24 = vadd.f32 %v410_v18, %v1346_v58 }
 0x124   : > { %v771_v20 = vpop.f32.mrf.mxu2  ;;  %v500_v25 = vadd.f32 %v499_v19, %v1348_v59 }
 0x125   : > { %v860_v21 = vpop.f32.mrf.mxu3  ;;  %v772_v22 = vadd.f32 %v1419_v17, %v771_v20  ;;  %v570_v30 = vmax.f32 %v411_v24, 0.0 }
 0x126   : > { %v571_v33 = vmax.f32 %v500_v25, 0.0 }
 0x127   : > { %v861_v23 = vadd.f32 %v860_v21, %v772_v22 }
 0x129   : > { %941 = vst.msk [vmem:[%s1427_s8] sm:$0xff] %vm940_vm1, %v861_v23 }
 0x12a   : > { %v412_v26 = vpop.f32.mrf.mxu0 }
 0x12b   : > { %v501_v27 = vpop.f32.mrf.mxu1  ;;  %v413_v28 = vadd.f32 %v412_v26, %v1346_v58 }
 0x12c   : > { %v502_v29 = vadd.f32 %v501_v27, %v1348_v59  ;;  %v773_v31 = vpop.f32.mrf.mxu2 }
 0x12d   : > { %v862_v32 = vpop.f32.mrf.mxu3  ;;  %v572_v34 = vmax.f32 %v413_v28, 0.0  ;;  %v774_v36 = vadd.f32 %v1419_v17, %v773_v31 }
 0x12e   : > { %v573_v35 = vmax.f32 %v502_v29, 0.0 }
 0x12f   : > { %v863_v37 = vadd.f32 %v862_v32, %v774_v36  ;;  %v616_v38 = vpack.c.bf16 %v572_v34, %v570_v30 }
 0x130   : > { %v617_v39 = vpack.c.bf16 %v573_v35, %v571_v33 }
 0x131   : > { %942 = vst.msk [vmem:[%s1427_s8 + $0x8] sm:$0xff] %vm940_vm1, %v863_v37  ;;  %815 = vmatmul.bf16.gmra.mxu2 %v616_v38 }
 0x132   : > { %904 = vmatmul.bf16.gmra.mxu3 %v617_v39  ;;  %v415_v40 = vpop.f32.mrf.mxu0 }
 0x133   : > { %v504_v41 = vpop.f32.mrf.mxu1  ;;  %v416_v46 = vadd.f32 %v415_v40, %v1346_v58 }
 0x134   : > { %v776_v42 = vpop.f32.mrf.mxu2  ;;  %v505_v47 = vadd.f32 %v504_v41, %v1348_v59 }
 0x135   : > { %v865_v43 = vpop.f32.mrf.mxu3  ;;  %v777_v44 = vadd.f32 %v1419_v17, %v776_v42  ;;  %v574_v52 = vmax.f32 %v416_v46, 0.0 }
 0x136   : > { %v575_v55 = vmax.f32 %v505_v47, 0.0 }
 0x137   : > { %v866_v45 = vadd.f32 %v865_v43, %v777_v44 }
 0x139   : > { %943 = vst.msk [vmem:[%s1427_s8 + $0x10] sm:$0xff] %vm940_vm1, %v866_v45 }
 0x13a   : > { %v417_v48 = vpop.f32.mrf.mxu0 }
 0x13b   : > { %v506_v49 = vpop.f32.mrf.mxu1  ;;  %v418_v50 = vadd.f32 %v417_v48, %v1346_v58 }
 0x13c   : > { %v507_v51 = vadd.f32 %v506_v49, %v1348_v59  ;;  %v778_v53 = vpop.f32.mrf.mxu2 }
 0x13d   : > { %v867_v54 = vpop.f32.mrf.mxu3  ;;  %v576_v56 = vmax.f32 %v418_v50, 0.0  ;;  %v779_v60 = vadd.f32 %v1419_v17, %v778_v53 }
 0x13e   : > { %v577_v57 = vmax.f32 %v507_v51, 0.0 }
 0x13f   : > { %v868_v61 = vadd.f32 %v867_v54, %v779_v60  ;;  %v618_v62 = vpack.c.bf16 %v576_v56, %v574_v52 }
 0x140   : > { %v619_v63 = vpack.c.bf16 %v577_v57, %v575_v55 }
 0x141   : > { %944 = vst.msk [vmem:[%s1427_s8 + $0x18] sm:$0xff] %vm940_vm1, %v868_v61  ;;  %820 = vmatmul.bf16.gmra.mxu2 %v618_v62 }
 0x142   : > { %909 = vmatmul.bf16.gmra.mxu3 %v619_v63  ;;  %v420_v0 = vpop.f32.mrf.mxu0 }
 0x143   : > { %v509_v1 = vpop.f32.mrf.mxu1  ;;  %v421_v6 = vadd.f32 %v420_v0, %v1346_v58 }
 0x144   : > { %v781_v2 = vpop.f32.mrf.mxu2  ;;  %v510_v7 = vadd.f32 %v509_v1, %v1348_v59 }
 0x145   : > { %v870_v3 = vpop.f32.mrf.mxu3  ;;  %v782_v4 = vadd.f32 %v1419_v17, %v781_v2  ;;  %v578_v12 = vmax.f32 %v421_v6, 0.0 }
 0x146   : > { %v579_v15 = vmax.f32 %v510_v7, 0.0 }
 0x147   : > { %v871_v5 = vadd.f32 %v870_v3, %v782_v4 }
 0x149   : > { %945 = vst.msk [vmem:[%s1427_s8 + $0x20] sm:$0xff] %vm940_vm1, %v871_v5 }
 0x14a   : > { %v422_v8 = vpop.f32.mrf.mxu0 }
 0x14b   : > { %v511_v9 = vpop.f32.mrf.mxu1  ;;  %v423_v10 = vadd.f32 %v422_v8, %v1346_v58 }
 0x14c   : > { %v512_v11 = vadd.f32 %v511_v9, %v1348_v59  ;;  %v783_v13 = vpop.f32.mrf.mxu2 }
 0x14d   : > { %v872_v14 = vpop.f32.mrf.mxu3  ;;  %v580_v16 = vmax.f32 %v423_v10, 0.0  ;;  %v784_v19 = vadd.f32 %v1419_v17, %v783_v13 }
 0x14e   : > { %v581_v18 = vmax.f32 %v512_v11, 0.0 }
 0x14f   : > { %v873_v20 = vadd.f32 %v872_v14, %v784_v19  ;;  %v620_v21 = vpack.c.bf16 %v580_v16, %v578_v12 }
 0x150   : > { %v621_v22 = vpack.c.bf16 %v581_v18, %v579_v15 }
 0x151   : > { %946 = vst.msk [vmem:[%s1427_s8 + $0x28] sm:$0xff] %vm940_vm1, %v873_v20  ;;  %825 = vmatmul.bf16.gmra.mxu2 %v620_v21 }
 0x152   : > { %914 = vmatmul.bf16.gmra.mxu3 %v621_v22  ;;  %v425_v23 = vpop.f32.mrf.mxu0 }
 0x153   : > { %v514_v24 = vpop.f32.mrf.mxu1  ;;  %v426_v29 = vadd.f32 %v425_v23, %v1346_v58 }
 0x154   : > { %v786_v25 = vpop.f32.mrf.mxu2  ;;  %v515_v30 = vadd.f32 %v514_v24, %v1348_v59 }
 0x155   : > { %v875_v26 = vpop.f32.mrf.mxu3  ;;  %v787_v27 = vadd.f32 %v1419_v17, %v786_v25  ;;  %v582_v35 = vmax.f32 %v426_v29, 0.0 }
 0x156   : > { %v583_v38 = vmax.f32 %v515_v30, 0.0 }
 0x157   : > { %v876_v28 = vadd.f32 %v875_v26, %v787_v27 }
 0x159   : > { %947 = vst.msk [vmem:[%s1427_s8 + $0x30] sm:$0xff] %vm940_vm1, %v876_v28 }
 0x15a   : > { %v427_v31 = vpop.f32.mrf.mxu0 }
 0x15b   : > { %v516_v32 = vpop.f32.mrf.mxu1  ;;  %v428_v33 = vadd.f32 %v427_v31, %v1346_v58 }
 0x15c   : > { %v517_v34 = vadd.f32 %v516_v32, %v1348_v59  ;;  %v788_v36 = vpop.f32.mrf.mxu2 }
 0x15d   : > { %v877_v37 = vpop.f32.mrf.mxu3  ;;  %v584_v39 = vmax.f32 %v428_v33, 0.0  ;;  %v789_v41 = vadd.f32 %v1419_v17, %v788_v36 }
 0x15e   : > { %v585_v40 = vmax.f32 %v517_v34, 0.0 }
 0x15f   : > { %v622_v42 = vpack.c.bf16 %v584_v39, %v582_v35  ;;  %v878_v44 = vadd.f32 %v877_v37, %v789_v41 }
 0x160   : > { %v623_v43 = vpack.c.bf16 %v585_v40, %v583_v38 }
 0x161   : > { %948 = vst.msk [vmem:[%s1427_s8 + $0x38] sm:$0xff] %vm940_vm1, %v878_v44  ;;  %830 = vmatmul.bf16.gmra.mxu2 %v622_v42 }
 0x162   : > { %919 = vmatmul.bf16.gmra.mxu3 %v623_v43  ;;  %v430_v45 = vpop.f32.mrf.mxu0 }
 0x163   : > { %v519_v46 = vpop.f32.mrf.mxu1  ;;  %v431_v51 = vadd.f32 %v430_v45, %v1346_v58 }
 0x164   : > { %v791_v47 = vpop.f32.mrf.mxu2  ;;  %v520_v52 = vadd.f32 %v519_v46, %v1348_v59 }
 0x165   : > { %v880_v48 = vpop.f32.mrf.mxu3  ;;  %v792_v49 = vadd.f32 %v1419_v17, %v791_v47  ;;  %v586_v57 = vmax.f32 %v431_v51, 0.0 }
 0x166   : > { %v587_v62 = vmax.f32 %v520_v52, 0.0 }
 0x167   : > { %v881_v50 = vadd.f32 %v880_v48, %v792_v49 }
 0x169   : > { %949 = vst.msk [vmem:[%s1427_s8 + $0x40] sm:$0xff] %vm940_vm1, %v881_v50 }
 0x16a   : > { %v432_v53 = vpop.f32.mrf.mxu0 }
 0x16b   : > { %v521_v54 = vpop.f32.mrf.mxu1  ;;  %v433_v55 = vadd.f32 %v432_v53, %v1346_v58 }
 0x16c   : > { %v522_v56 = vadd.f32 %v521_v54, %v1348_v59  ;;  %v793_v60 = vpop.f32.mrf.mxu2 }
 0x16d   : > { %v882_v61 = vpop.f32.mrf.mxu3  ;;  %v588_v63 = vmax.f32 %v433_v55, 0.0  ;;  %v794_v1 = vadd.f32 %v1419_v17, %v793_v60 }
 0x16e   : > { %v589_v0 = vmax.f32 %v522_v56, 0.0 }
 0x16f   : > { %v624_v2 = vpack.c.bf16 %v588_v63, %v586_v57  ;;  %v883_v4 = vadd.f32 %v882_v61, %v794_v1 }
 0x170   : > { %v625_v3 = vpack.c.bf16 %v589_v0, %v587_v62 }
 0x171   : > { %950 = vst.msk [vmem:[%s1427_s8 + $0x48] sm:$0xff] %vm940_vm1, %v883_v4  ;;  %835 = vmatmul.bf16.gmra.mxu2 %v624_v2 }
 0x172   : > { %924 = vmatmul.bf16.gmra.mxu3 %v625_v3  ;;  %v435_v5 = vpop.f32.mrf.mxu0 }
 0x173   : > { %v524_v6 = vpop.f32.mrf.mxu1  ;;  %v436_v11 = vadd.f32 %v435_v5, %v1346_v58 }
 0x174   : > { %v796_v7 = vpop.f32.mrf.mxu2  ;;  %v525_v12 = vadd.f32 %v524_v6, %v1348_v59 }
 0x175   : > { %v885_v8 = vpop.f32.mrf.mxu3  ;;  %v797_v9 = vadd.f32 %v1419_v17, %v796_v7  ;;  %v590_v18 = vmax.f32 %v436_v11, 0.0 }
 0x176   : > { %v591_v21 = vmax.f32 %v525_v12, 0.0 }
 0x177   : > { %v886_v10 = vadd.f32 %v885_v8, %v797_v9 }
 0x179   : > { %951 = vst.msk [vmem:[%s1427_s8 + $0x50] sm:$0xff] %vm940_vm1, %v886_v10 }
 0x17a   : > { %v437_v13 = vpop.f32.mrf.mxu0 }
 0x17b   : > { %v526_v14 = vpop.f32.mrf.mxu1  ;;  %v438_v15 = vadd.f32 %v437_v13, %v1346_v58 }
 0x17c   : > { %v527_v16 = vadd.f32 %v526_v14, %v1348_v59  ;;  %v798_v19 = vpop.f32.mrf.mxu2 }
 0x17d   : > { %v887_v20 = vpop.f32.mrf.mxu3  ;;  %v592_v22 = vmax.f32 %v438_v15, 0.0  ;;  %v799_v24 = vadd.f32 %v1419_v17, %v798_v19 }
 0x17e   : > { %v593_v23 = vmax.f32 %v527_v16, 0.0 }
 0x17f   : > { %v626_v25 = vpack.c.bf16 %v592_v22, %v590_v18  ;;  %v888_v27 = vadd.f32 %v887_v20, %v799_v24 }
 0x180   : > { %v627_v26 = vpack.c.bf16 %v593_v23, %v591_v21 }
 0x181   : > { %952 = vst.msk [vmem:[%s1427_s8 + $0x58] sm:$0xff] %vm940_vm1, %v888_v27  ;;  %840 = vmatmul.bf16.gmra.mxu2 %v626_v25 }
 0x182   : > { %929 = vmatmul.bf16.gmra.mxu3 %v627_v26  ;;  %v440_v28 = vpop.f32.mrf.mxu0 }
 0x183   : > { %v529_v29 = vpop.f32.mrf.mxu1  ;;  %v441_v34 = vadd.f32 %v440_v28, %v1346_v58 }
 0x184   : > { %v801_v30 = vpop.f32.mrf.mxu2  ;;  %v530_v35 = vadd.f32 %v529_v29, %v1348_v59 }
 0x185   : > { %v890_v31 = vpop.f32.mrf.mxu3  ;;  %v802_v32 = vadd.f32 %v1419_v17, %v801_v30  ;;  %v594_v40 = vmax.f32 %v441_v34, 0.0 }
 0x186   : > { %v595_v43 = vmax.f32 %v530_v35, 0.0 }
 0x187   : > { %v891_v33 = vadd.f32 %v890_v31, %v802_v32 }
 0x189   : > { %953 = vst.msk [vmem:[%s1427_s8 + $0x60] sm:$0xff] %vm940_vm1, %v891_v33 }
 0x18a   : > { %v442_v36 = vpop.f32.mrf.mxu0 }
 0x18b   : > { %v531_v37 = vpop.f32.mrf.mxu1  ;;  %v443_v38 = vadd.f32 %v442_v36, %v1346_v58 }
 0x18c   : > { %v532_v39 = vadd.f32 %v531_v37, %v1348_v59  ;;  %v803_v41 = vpop.f32.mrf.mxu2 }
 0x18d   : > { %v892_v42 = vpop.f32.mrf.mxu3  ;;  %v596_v44 = vmax.f32 %v443_v38, 0.0  ;;  %v804_v46 = vadd.f32 %v1419_v17, %v803_v41 }
 0x18e   : > { %v597_v45 = vmax.f32 %v532_v39, 0.0 }
 0x18f   : > { %v628_v47 = vpack.c.bf16 %v596_v44, %v594_v40  ;;  %v893_v49 = vadd.f32 %v892_v42, %v804_v46 }
 0x190   : > { %v629_v48 = vpack.c.bf16 %v597_v45, %v595_v43 }
 0x191   : > { %954 = vst.msk [vmem:[%s1427_s8 + $0x68] sm:$0xff] %vm940_vm1, %v893_v49  ;;  %845 = vmatmul.bf16.gmra.mxu2 %v628_v47 }
 0x192   : > { %934 = vmatmul.bf16.gmra.mxu3 %v629_v48 }
 0x194   : > { %v806_v58 = vpop.f32.mrf.mxu2 }
 0x195   : > { %v895_v59 = vpop.f32.mrf.mxu3  ;;  %v807_v50 = vadd.f32 %v1419_v17, %v806_v58 }
 0x197   : > { %v896_v51 = vadd.f32 %v895_v59, %v807_v50 }
 0x199   : > { %955 = vst.msk [vmem:[%s1427_s8 + $0x70] sm:$0xff] %vm940_vm1, %v896_v51 }
 0x19c   : > { %v808_v52 = vpop.f32.mrf.mxu2 }
 0x19d   : > { %v897_v53 = vpop.f32.mrf.mxu3  ;;  %v809_v54 = vadd.f32 %v1419_v17, %v808_v52 }
 0x19f   : > { %v898_v55 = vadd.f32 %v897_v53, %v809_v54 }
 0x1a1   : > { %956 = vst.msk [vmem:[%s1427_s8 + $0x78] sm:$0xff] %vm940_vm1, %v898_v55 }
 0x1a4   : > { %v811_v56 = vpop.f32.mrf.mxu2 }
 0x1a5   : > { %v900_v57 = vpop.f32.mrf.mxu3  ;;  %v812_v60 = vadd.f32 %v1419_v17, %v811_v56 }
 0x1a7   : > { %v901_v61 = vadd.f32 %v900_v57, %v812_v60 }
 0x1a9   : > { %957 = vst.msk [vmem:[%s1427_s8 + $0x80] sm:$0xff] %vm940_vm1, %v901_v61 }
 0x1ac   : > { %v813_v62 = vpop.f32.mrf.mxu2 }
 0x1ad   : > { %v902_v63 = vpop.f32.mrf.mxu3  ;;  %v814_v0 = vadd.f32 %v1419_v17, %v813_v62 }
 0x1af   : > { %v903_v1 = vadd.f32 %v902_v63, %v814_v0 }
 0x1b1   : > { %958 = vst.msk [vmem:[%s1427_s8 + $0x88] sm:$0xff] %vm940_vm1, %v903_v1 }
 0x1b4   : > { %v816_v2 = vpop.f32.mrf.mxu2 }
 0x1b5   : > { %v905_v3 = vpop.f32.mrf.mxu3  ;;  %v817_v4 = vadd.f32 %v1419_v17, %v816_v2 }
 0x1b7   : > { %v906_v5 = vadd.f32 %v905_v3, %v817_v4 }
 0x1b9   : > { %959 = vst.msk [vmem:[%s1427_s8 + $0x90] sm:$0xff] %vm940_vm1, %v906_v5 }
 0x1bc   : > { %v818_v6 = vpop.f32.mrf.mxu2 }
 0x1bd   : > { %v907_v7 = vpop.f32.mrf.mxu3  ;;  %v819_v8 = vadd.f32 %v1419_v17, %v818_v6 }
 0x1bf   : > { %v908_v9 = vadd.f32 %v907_v7, %v819_v8 }
 0x1c1   : > { %960 = vst.msk [vmem:[%s1427_s8 + $0x98] sm:$0xff] %vm940_vm1, %v908_v9 }
 0x1c4   : > { %v821_v10 = vpop.f32.mrf.mxu2 }
 0x1c5   : > { %v910_v11 = vpop.f32.mrf.mxu3  ;;  %v822_v12 = vadd.f32 %v1419_v17, %v821_v10 }
 0x1c7   : > { %v911_v13 = vadd.f32 %v910_v11, %v822_v12 }
 0x1c9   : > { %961 = vst.msk [vmem:[%s1427_s8 + $0xa0] sm:$0xff] %vm940_vm1, %v911_v13 }
 0x1cc   : > { %v823_v14 = vpop.f32.mrf.mxu2 }
 0x1cd   : > { %v912_v15 = vpop.f32.mrf.mxu3  ;;  %v824_v16 = vadd.f32 %v1419_v17, %v823_v14 }
 0x1cf   : > { %v913_v18 = vadd.f32 %v912_v15, %v824_v16 }
 0x1d1   : > { %962 = vst.msk [vmem:[%s1427_s8 + $0xa8] sm:$0xff] %vm940_vm1, %v913_v18 }
 0x1d4   : > { %v826_v19 = vpop.f32.mrf.mxu2 }
 0x1d5   : > { %v915_v20 = vpop.f32.mrf.mxu3  ;;  %v827_v21 = vadd.f32 %v1419_v17, %v826_v19 }
 0x1d7   : > { %v916_v22 = vadd.f32 %v915_v20, %v827_v21 }
 0x1d9   : > { %963 = vst.msk [vmem:[%s1427_s8 + $0xb0] sm:$0xff] %vm940_vm1, %v916_v22 }
 0x1dc   : > { %v828_v23 = vpop.f32.mrf.mxu2 }
 0x1dd   : > { %v917_v24 = vpop.f32.mrf.mxu3  ;;  %v829_v25 = vadd.f32 %v1419_v17, %v828_v23 }
 0x1df   : > { %v918_v26 = vadd.f32 %v917_v24, %v829_v25 }
 0x1e1   : > { %964 = vst.msk [vmem:[%s1427_s8 + $0xb8] sm:$0xff] %vm940_vm1, %v918_v26 }
 0x1e4   : > { %v831_v27 = vpop.f32.mrf.mxu2 }
 0x1e5   : > { %v920_v28 = vpop.f32.mrf.mxu3  ;;  %v832_v29 = vadd.f32 %v1419_v17, %v831_v27 }
 0x1e7   : > { %v921_v30 = vadd.f32 %v920_v28, %v832_v29 }
 0x1e9   : > { %965 = vst.msk [vmem:[%s1427_s8 + $0xc0] sm:$0xff] %vm940_vm1, %v921_v30 }
 0x1ec   : > { %v833_v31 = vpop.f32.mrf.mxu2 }
 0x1ed   : > { %v922_v32 = vpop.f32.mrf.mxu3  ;;  %v834_v33 = vadd.f32 %v1419_v17, %v833_v31 }
 0x1ef   : > { %v923_v34 = vadd.f32 %v922_v32, %v834_v33 }
 0x1f1   : > { %966 = vst.msk [vmem:[%s1427_s8 + $0xc8] sm:$0xff] %vm940_vm1, %v923_v34 }
 0x1f4   : > { %v836_v35 = vpop.f32.mrf.mxu2 }
 0x1f5   : > { %v925_v36 = vpop.f32.mrf.mxu3  ;;  %v837_v37 = vadd.f32 %v1419_v17, %v836_v35 }
 0x1f7   : > { %v926_v38 = vadd.f32 %v925_v36, %v837_v37 }
 0x1f9   : > { %967 = vst.msk [vmem:[%s1427_s8 + $0xd0] sm:$0xff] %vm940_vm1, %v926_v38 }
 0x1fc   : > { %v838_v39 = vpop.f32.mrf.mxu2 }
 0x1fd   : > { %v927_v40 = vpop.f32.mrf.mxu3  ;;  %v839_v41 = vadd.f32 %v1419_v17, %v838_v39 }
 0x1ff   : > { %v928_v42 = vadd.f32 %v927_v40, %v839_v41 }
 0x201   : > { %968 = vst.msk [vmem:[%s1427_s8 + $0xd8] sm:$0xff] %vm940_vm1, %v928_v42 }
 0x204   : > { %v841_v43 = vpop.f32.mrf.mxu2 }
 0x205   : > { %v930_v44 = vpop.f32.mrf.mxu3  ;;  %v842_v45 = vadd.f32 %v1419_v17, %v841_v43 }
 0x207   : > { %v931_v46 = vadd.f32 %v930_v44, %v842_v45 }
 0x209   : > { %969 = vst.msk [vmem:[%s1427_s8 + $0xe0] sm:$0xff] %vm940_vm1, %v931_v46 }
 0x20c   : > { %v843_v47 = vpop.f32.mrf.mxu2 }
 0x20d   : > { %v932_v48 = vpop.f32.mrf.mxu3  ;;  %v844_v49 = vadd.f32 %v1419_v17, %v843_v47 }
 0x20f   : > { %v933_v58 = vadd.f32 %v932_v48, %v844_v49 }
 0x211   : > { %970 = vst.msk [vmem:[%s1427_s8 + $0xe8] sm:$0xff] %vm940_vm1, %v933_v58 }
 0x214   : > { %v846_v59 = vpop.f32.mrf.mxu2 }
 0x215   : > { %v935_v50 = vpop.f32.mrf.mxu3  ;;  %v847_v51 = vadd.f32 %v1419_v17, %v846_v59 }
 0x217   : > { %v936_v52 = vadd.f32 %v935_v50, %v847_v51 }
 0x219   : > { %971 = vst.msk [vmem:[%s1427_s8 + $0xf0] sm:$0xff] %vm940_vm1, %v936_v52 }
 0x21c   : > { %v848_v53 = vpop.f32.mrf.mxu2 }
 0x21d   : > { %v849_v54 = vadd.f32 %v1419_v17, %v848_v53  ;;  %v937_v55 = vpop.f32.mrf.mxu3 }
 0x21f   : > { %v938_v56 = vadd.f32 %v937_v55, %v849_v54 }
 0x221   : > { %972 = vst.msk [vmem:[%s1427_s8 + $0xf8] sm:$0xff] %vm940_vm1, %v938_v56 }
 0x222 PF: > { %s15_s18 = sadd.s32 1, %s1187_s18  }
 0x223   : > { %p12_p4 = scmp.ge.s32.totalorder %s15_s18, 4  }
 0x225   :  { %14 = sbr.rel (!%p12_p4) target bundleno = 1 (0x1), region = 70 }

</bundles_post_ra>
